<compile_context>
chip_gen: v5e
topology: v5e:2x2
jax: 0.10.0
libtpu: 0.0.40
codegen_flags: <defaults>
</compile_context>

<pallas_src>
import math
from functools import partial

import jax
import jax.numpy as jnp
from jax.experimental import pallas as pl
from jax.experimental.pallas import tpu as pltpu


# ----------------------------------------------------------------------------
# schedule (plain-JAX glue, mirrors the PyTorch buffer construction)
# ----------------------------------------------------------------------------
def cosine_alpha_schedule(timesteps, s=0.008):
    t = jnp.linspace(0.0, timesteps - 1, timesteps) / (timesteps - 1)
    alphas_cumprod = jnp.cos((t + s) / (1 + s) * math.pi * 0.5) ** 2
    alphas_cumprod = alphas_cumprod / alphas_cumprod[0]
    return jnp.clip(alphas_cumprod, 0.0, 0.9999)


# ----------------------------------------------------------------------------
# Fused forward kernel.
#
# Scalar prefetch (SMEM):
#   sched_ref : f32[2*T + 6]  = [alphas_cumprod(T), temb(T), w0,w1,w2,wa,wn,b]
#   t_ref     : i32[1]          shared timestep for the whole batch
# VMEM inputs :  x (B, 3, HW), y (B, HW)
# VMEM outputs:  x_recon (B, HW), x_mix_mid (B, HW),
#                x_recon_sub1 (B, HW), x_mix_sub1_mid (B, HW)
# ----------------------------------------------------------------------------
def _fused_diffusion_kernel(sched_ref, t_ref, x_ref, y_ref,
                            xrec_ref, xmixmid_ref, xrec1_ref, xmix1mid_ref,
                            *, num_timesteps):
    T = num_timesteps

    # --- scalars (SMEM) -------------------------------------------------------
    ti = t_ref[0]                         # shared timestep
    a0 = sched_ref[ti]                    # alphas_cumprod[t]
    om0 = 1.0 - a0                        # one_minus_alphas_cumprod[t]
    te0 = sched_ref[T + ti]               # time embedding (synthetic denoise_fn)

    w0 = sched_ref[2 * T + 0]
    w1 = sched_ref[2 * T + 1]
    w2 = sched_ref[2 * T + 2]
    wa = sched_ref[2 * T + 3]
    wn = sched_ref[2 * T + 4]
    bias = sched_ref[2 * T + 5]

    # --- image slabs (each (B, HW), lane-dense) -------------------------------
    xv = x_ref[...]                       # (B, 3, HW), single VMEM load
    up = xv[:, 0, :]                      # x[:, 0]
    x_end = xv[:, 1, :]                   # x[:, 1]  (= noise / x_end)
    down = xv[:, 2, :]                    # x[:, 2]
    yv = y_ref[...]                       # y[:, 0]

    # --- stage 1: x_mix = q_sample(y, x_end, t); denoise(adjust=False) --------
    x_mix_mid = a0 * yv + om0 * x_end
    val1 = (w0 * up + w1 * x_mix_mid + w2 * down
            + wa * yv + wn * x_end + bias + te0)
    x_recon = jnp.tanh(val1)

    xrec_ref[...] = x_recon.astype(xrec_ref.dtype)
    xmixmid_ref[...] = x_mix_mid.astype(xmixmid_ref.dtype)

    # default (t == 0): second-stage outputs equal first-stage outputs
    xrec1_ref[...] = x_recon.astype(xrec1_ref.dtype)
    xmix1mid_ref[...] = x_mix_mid.astype(xmix1mid_ref.dtype)

    # --- stage 2 (only when t >= 1): q_sample(x_recon, x_end, t-1);
    #     denoise(adjust=True) ------------------------------------------------
    @pl.when(ti >= 1)
    def _stage2():
        tm1 = ti - 1                      # ti >= 1 here, so no clamp needed
        a1 = sched_ref[tm1]
        om1 = 1.0 - a1
        te1 = sched_ref[T + tm1]

        x_mix1_mid = a1 * x_recon + om1 * x_end
        val2 = (w0 * up + w1 * x_mix1_mid + w2 * down
                + wa * x_recon + wn * x_end + bias + te1)
        val2 = val2 + 0.1 * (x_recon - x_end)      # adjust=True term (synthetic)
        xrec1_ref[...] = jnp.tanh(val2).astype(xrec1_ref.dtype)
        xmix1mid_ref[...] = x_mix1_mid.astype(xmix1mid_ref.dtype)


def diffusion_forward_pallas(sched_packed, x, y, t_single, num_timesteps):
    """Fused forward. x: (B, 3, H, W), y: (B, 1, H, W), t_single: (1,) int32."""
    B, Cx, H, W = x.shape
    assert Cx == 3
    HW = H * W

    # Copy-free reshapes only (no transposes): (B, 3, HW) and (B, HW).
    x_f = x.reshape(B, Cx, HW)
    y_f = y.reshape(B, HW)

    out_shapes = (
        jax.ShapeDtypeStruct((B, HW), x.dtype),   # x_recon
        jax.ShapeDtypeStruct((B, HW), x.dtype),   # x_mix      (mid channel only)
        jax.ShapeDtypeStruct((B, HW), x.dtype),   # x_recon_sub1
        jax.ShapeDtypeStruct((B, HW), x.dtype),   # x_mix_sub1 (mid channel only)
    )

    grid_spec = pltpu.PrefetchScalarGridSpec(
        num_scalar_prefetch=2,            # packed schedule table + timestep
        grid=(1,),                        # single step: whole problem in VMEM
        in_specs=[
            pl.BlockSpec((B, Cx, HW), lambda i, s, t: (0, 0, 0)),
            pl.BlockSpec((B, HW),     lambda i, s, t: (0, 0)),
        ],
        out_specs=[
            pl.BlockSpec((B, HW), lambda i, s, t: (0, 0)),
            pl.BlockSpec((B, HW), lambda i, s, t: (0, 0)),
            pl.BlockSpec((B, HW), lambda i, s, t: (0, 0)),
            pl.BlockSpec((B, HW), lambda i, s, t: (0, 0)),
        ],
    )

    xrec, xmixmid, xrec1, xmix1mid = pl.pallas_call(
        partial(_fused_diffusion_kernel, num_timesteps=num_timesteps),
        out_shape=out_shapes,
        grid_spec=grid_spec,
        compiler_params=pltpu.CompilerParams(
            dimension_semantics=("arbitrary",)),
    )(sched_packed, t_single, x_f, y_f)

    # Reshape-only output plumbing; unchanged up/down channels come from x.
    x_recon = xrec.reshape(B, 1, H, W)
    x_recon_sub1 = xrec1.reshape(B, 1, H, W)
    x_mix = x.at[:, 1:2].set(xmixmid.reshape(B, 1, H, W))
    x_mix_sub1 = x.at[:, 1:2].set(xmix1mid.reshape(B, 1, H, W))
    return x_recon, x_mix, x_recon_sub1, x_mix_sub1


@partial(jax.jit, static_argnames=("num_timesteps",))
def _diffusion_forward_jit(sched_packed, x, y, key, num_timesteps):
    # torch.randint(0, num_timesteps, (1,)) reproduced with jax.random; the
    # timestep stays on-device (no host sync) and is shared across the batch.
    t_single = jax.random.randint(key, (1,), 0, num_timesteps, dtype=jnp.int32)
    return diffusion_forward_pallas(sched_packed, x, y, t_single, num_timesteps)


# ----------------------------------------------------------------------------
# Diffusion module (JAX/Pallas port of the PyTorch class; forward only)
# ----------------------------------------------------------------------------
class Diffusion:
    def __init__(self, denoise_params, channels=1, timesteps=10):
        self.channels = channels
        self.num_timesteps = int(timesteps)
        self.alphas_cumprod = cosine_alpha_schedule(timesteps).astype(jnp.float32)
        self.one_minus_alphas_cumprod = (1.0 - self.alphas_cumprod).astype(jnp.float32)
        # synthetic denoise_fn parameters: ([w0,w1,w2,wa,wn,bias], temb[T])
        params, temb = denoise_params
        # Packed SMEM scalar table: [alphas_cumprod(T), temb(T), params(6)].
        self.sched_packed = jnp.concatenate([
            self.alphas_cumprod,
            temb.astype(jnp.float32),
            params.astype(jnp.float32),
        ])

    def forward(self, x, y, key):
        return _diffusion_forward_jit(self.sched_packed, x, y, key,
                                      self.num_timesteps)


if __name__ == "__main__":
    key = jax.random.PRNGKey(0)
    kx, ky, kt, kp, ke = jax.random.split(key, 5)

    B, H, W, T = 2, 16, 16, 10
    x = jax.random.uniform(kx, (B, 3, H, W), dtype=jnp.float32)   # (up, mid, down)
    y = jax.random.uniform(ky, (B, 1, H, W), dtype=jnp.float32)

    denoise_params = 0.1 * jax.random.normal(kp, (6,), dtype=jnp.float32)
    temb = 0.05 * jax.random.normal(ke, (T,), dtype=jnp.float32)

    model = Diffusion((denoise_params, temb), channels=1, timesteps=T)
    outs = model.forward(x, y, kt)
    jax.block_until_ready(outs)

    x_recon, x_mix, x_recon_sub1, x_mix_sub1 = outs
    assert x_recon.shape == (B, 1, H, W)
    assert x_mix.shape == (B, 3, H, W)
    assert x_recon_sub1.shape == (B, 1, H, W)
    assert x_mix_sub1.shape == (B, 3, H, W)
    print("KERNEL_OK")
</pallas_src>

<mosaic_0001>
module attributes {stable_mosaic.version = 11 : i64} {
  func.func @_fused_diffusion_kernel(%arg0: i32, %arg1: memref<26xf32, #tpu.memory_space<smem>>, %arg2: memref<1xi32, #tpu.memory_space<smem>>, %arg3: memref<2x3x256xf32, #tpu.memory_space<vmem>>, %arg4: memref<2x256xf32, #tpu.memory_space<vmem>>, %arg5: memref<2x256xf32, #tpu.memory_space<vmem>>, %arg6: memref<2x256xf32, #tpu.memory_space<vmem>>, %arg7: memref<2x256xf32, #tpu.memory_space<vmem>>, %arg8: memref<2x256xf32, #tpu.memory_space<vmem>>) attributes {dimension_semantics = [#tpu.dimension_semantics<arbitrary>], iteration_bounds = array<i64: 1>, scalar_prefetch = 2 : i64, scratch_operands = 0 : i64, tpu.core_type = #tpu.core_type<tc>, window_params = [{pipeline_mode = #tpu.pipeline_mode<synchronous>, transform_indices = @transform_0, window_bounds = array<i64: 2, 3, 256>}, {pipeline_mode = #tpu.pipeline_mode<synchronous>, transform_indices = @transform_1, window_bounds = array<i64: 2, 256>}, {pipeline_mode = #tpu.pipeline_mode<synchronous>, transform_indices = @transform_2, window_bounds = array<i64: 2, 256>}, {pipeline_mode = #tpu.pipeline_mode<synchronous>, transform_indices = @transform_3, window_bounds = array<i64: 2, 256>}, {pipeline_mode = #tpu.pipeline_mode<synchronous>, transform_indices = @transform_4, window_bounds = array<i64: 2, 256>}, {pipeline_mode = #tpu.pipeline_mode<synchronous>, transform_indices = @transform_5, window_bounds = array<i64: 2, 256>}]} {
    %c0 = arith.constant 0 : index
    %0 = memref.load %arg2[%c0] : memref<1xi32, #tpu.memory_space<smem>>
    %1 = arith.index_cast %0 : i32 to index
    %2 = memref.load %arg1[%1] : memref<26xf32, #tpu.memory_space<smem>>
    %cst = arith.constant 1.000000e+00 : f32
    %3 = arith.subf %cst, %2 : f32
    %c10_i32 = arith.constant 10 : i32
    %4 = arith.addi %c10_i32, %0 : i32
    %5 = arith.index_cast %4 : i32 to index
    %6 = memref.load %arg1[%5] : memref<26xf32, #tpu.memory_space<smem>>
    %c20 = arith.constant 20 : index
    %7 = memref.load %arg1[%c20] : memref<26xf32, #tpu.memory_space<smem>>
    %c21 = arith.constant 21 : index
    %8 = memref.load %arg1[%c21] : memref<26xf32, #tpu.memory_space<smem>>
    %c22 = arith.constant 22 : index
    %9 = memref.load %arg1[%c22] : memref<26xf32, #tpu.memory_space<smem>>
    %c23 = arith.constant 23 : index
    %10 = memref.load %arg1[%c23] : memref<26xf32, #tpu.memory_space<smem>>
    %c24 = arith.constant 24 : index
    %11 = memref.load %arg1[%c24] : memref<26xf32, #tpu.memory_space<smem>>
    %c25 = arith.constant 25 : index
    %12 = memref.load %arg1[%c25] : memref<26xf32, #tpu.memory_space<smem>>
    %c0_0 = arith.constant 0 : index
    %c0_1 = arith.constant 0 : index
    %c0_2 = arith.constant 0 : index
    %13 = vector.load %arg3[%c0_0, %c0_1, %c0_2] : memref<2x3x256xf32, #tpu.memory_space<vmem>>, vector<2x3x256xf32>
    %14 = vector.extract_strided_slice %13 {offsets = [0, 0, 0], sizes = [2, 1, 256], strides = [1, 1, 1]} : vector<2x3x256xf32> to vector<2x1x256xf32>
    %15 = vector.shape_cast %14 : vector<2x1x256xf32> to vector<2x256xf32>
    %16 = vector.extract_strided_slice %13 {offsets = [0, 1, 0], sizes = [2, 1, 256], strides = [1, 1, 1]} : vector<2x3x256xf32> to vector<2x1x256xf32>
    %17 = vector.shape_cast %16 : vector<2x1x256xf32> to vector<2x256xf32>
    %18 = vector.extract_strided_slice %13 {offsets = [0, 2, 0], sizes = [2, 1, 256], strides = [1, 1, 1]} : vector<2x3x256xf32> to vector<2x1x256xf32>
    %19 = vector.shape_cast %18 : vector<2x1x256xf32> to vector<2x256xf32>
    %c0_3 = arith.constant 0 : index
    %c0_4 = arith.constant 0 : index
    %20 = vector.load %arg4[%c0_3, %c0_4] : memref<2x256xf32, #tpu.memory_space<vmem>>, vector<2x256xf32>
    %21 = vector.broadcast %2 : f32 to vector<2x256xf32>
    %22 = arith.mulf %21, %20 : vector<2x256xf32>
    %23 = vector.broadcast %3 : f32 to vector<2x256xf32>
    %24 = arith.mulf %23, %17 : vector<2x256xf32>
    %25 = arith.addf %22, %24 : vector<2x256xf32>
    %26 = vector.broadcast %7 : f32 to vector<2x256xf32>
    %27 = arith.mulf %26, %15 : vector<2x256xf32>
    %28 = vector.broadcast %8 : f32 to vector<2x256xf32>
    %29 = arith.mulf %28, %25 : vector<2x256xf32>
    %30 = arith.addf %27, %29 : vector<2x256xf32>
    %31 = vector.broadcast %9 : f32 to vector<2x256xf32>
    %32 = arith.mulf %31, %19 : vector<2x256xf32>
    %33 = arith.addf %30, %32 : vector<2x256xf32>
    %34 = vector.broadcast %10 : f32 to vector<2x256xf32>
    %35 = arith.mulf %34, %20 : vector<2x256xf32>
    %36 = arith.addf %33, %35 : vector<2x256xf32>
    %37 = vector.broadcast %11 : f32 to vector<2x256xf32>
    %38 = arith.mulf %37, %17 : vector<2x256xf32>
    %39 = arith.addf %36, %38 : vector<2x256xf32>
    %40 = vector.broadcast %12 : f32 to vector<2x256xf32>
    %41 = arith.addf %39, %40 : vector<2x256xf32>
    %42 = vector.broadcast %6 : f32 to vector<2x256xf32>
    %43 = arith.addf %41, %42 : vector<2x256xf32>
    %44 = math.tanh %43 : vector<2x256xf32>
    %c0_5 = arith.constant 0 : index
    %c0_6 = arith.constant 0 : index
    %45 = vector.load %arg5[%c0_5, %c0_6] : memref<2x256xf32, #tpu.memory_space<vmem>>, vector<2x256xf32>
    tpu.vector_store %arg5[%c0_5, %c0_6], %44 {strides = array<i32>} : memref<2x256xf32, #tpu.memory_space<vmem>>, vector<2x256xf32>,
    %c0_7 = arith.constant 0 : index
    %c0_8 = arith.constant 0 : index
    %46 = vector.load %arg6[%c0_7, %c0_8] : memref<2x256xf32, #tpu.memory_space<vmem>>, vector<2x256xf32>
    tpu.vector_store %arg6[%c0_7, %c0_8], %25 {strides = array<i32>} : memref<2x256xf32, #tpu.memory_space<vmem>>, vector<2x256xf32>,
    %c0_9 = arith.constant 0 : index
    %c0_10 = arith.constant 0 : index
    %47 = vector.load %arg7[%c0_9, %c0_10] : memref<2x256xf32, #tpu.memory_space<vmem>>, vector<2x256xf32>
    tpu.vector_store %arg7[%c0_9, %c0_10], %44 {strides = array<i32>} : memref<2x256xf32, #tpu.memory_space<vmem>>, vector<2x256xf32>,
    %c0_11 = arith.constant 0 : index
    %c0_12 = arith.constant 0 : index
    %48 = vector.load %arg8[%c0_11, %c0_12] : memref<2x256xf32, #tpu.memory_space<vmem>>, vector<2x256xf32>
    tpu.vector_store %arg8[%c0_11, %c0_12], %25 {strides = array<i32>} : memref<2x256xf32, #tpu.memory_space<vmem>>, vector<2x256xf32>,
    %c1_i32 = arith.constant 1 : i32
    %49 = arith.cmpi sge, %0, %c1_i32 : i32
    %50 = arith.extui %49 : i1 to i32
    %c0_i32 = arith.constant 0 : i32
    %51 = arith.cmpi ne, %50, %c0_i32 : i32
    scf.if %51 {
      %c1_i32_13 = arith.constant 1 : i32
      %52 = arith.subi %0, %c1_i32_13 : i32
      %53 = arith.index_cast %52 : i32 to index
      %54 = memref.load %arg1[%53] : memref<26xf32, #tpu.memory_space<smem>>
      %cst_14 = arith.constant 1.000000e+00 : f32
      %55 = arith.subf %cst_14, %54 : f32
      %c10_i32_15 = arith.constant 10 : i32
      %56 = arith.addi %c10_i32_15, %52 : i32
      %57 = arith.index_cast %56 : i32 to index
      %58 = memref.load %arg1[%57] : memref<26xf32, #tpu.memory_space<smem>>
      %59 = vector.broadcast %54 : f32 to vector<2x256xf32>
      %60 = arith.mulf %59, %44 : vector<2x256xf32>
      %61 = vector.broadcast %55 : f32 to vector<2x256xf32>
      %62 = arith.mulf %61, %17 : vector<2x256xf32>
      %63 = arith.addf %60, %62 : vector<2x256xf32>
      %64 = vector.broadcast %7 : f32 to vector<2x256xf32>
      %65 = arith.mulf %64, %15 : vector<2x256xf32>
      %66 = vector.broadcast %8 : f32 to vector<2x256xf32>
      %67 = arith.mulf %66, %63 : vector<2x256xf32>
      %68 = arith.addf %65, %67 : vector<2x256xf32>
      %69 = vector.broadcast %9 : f32 to vector<2x256xf32>
      %70 = arith.mulf %69, %19 : vector<2x256xf32>
      %71 = arith.addf %68, %70 : vector<2x256xf32>
      %72 = vector.broadcast %10 : f32 to vector<2x256xf32>
      %73 = arith.mulf %72, %44 : vector<2x256xf32>
      %74 = arith.addf %71, %73 : vector<2x256xf32>
      %75 = vector.broadcast %11 : f32 to vector<2x256xf32>
      %76 = arith.mulf %75, %17 : vector<2x256xf32>
      %77 = arith.addf %74, %76 : vector<2x256xf32>
      %78 = vector.broadcast %12 : f32 to vector<2x256xf32>
      %79 = arith.addf %77, %78 : vector<2x256xf32>
      %80 = vector.broadcast %58 : f32 to vector<2x256xf32>
      %81 = arith.addf %79, %80 : vector<2x256xf32>
      %82 = arith.subf %44, %17 : vector<2x256xf32>
      %cst_16 = arith.constant 1.000000e-01 : f32
      %83 = vector.broadcast %cst_16 : f32 to vector<2x256xf32>
      %84 = arith.mulf %83, %82 : vector<2x256xf32>
      %85 = arith.addf %81, %84 : vector<2x256xf32>
      %86 = math.tanh %85 : vector<2x256xf32>
      %c0_17 = arith.constant 0 : index
      %c0_18 = arith.constant 0 : index
      %87 = vector.load %arg7[%c0_17, %c0_18] : memref<2x256xf32, #tpu.memory_space<vmem>>, vector<2x256xf32>
      tpu.vector_store %arg7[%c0_17, %c0_18], %86 {strides = array<i32>} : memref<2x256xf32, #tpu.memory_space<vmem>>, vector<2x256xf32>,
      %c0_19 = arith.constant 0 : index
      %c0_20 = arith.constant 0 : index
      %88 = vector.load %arg8[%c0_19, %c0_20] : memref<2x256xf32, #tpu.memory_space<vmem>>, vector<2x256xf32>
      tpu.vector_store %arg8[%c0_19, %c0_20], %63 {strides = array<i32>} : memref<2x256xf32, #tpu.memory_space<vmem>>, vector<2x256xf32>,
    } else {
    }
    return
  }
  func.func @transform_0(%arg0: i32, %arg1: memref<26xf32, #tpu.memory_space<smem>>, %arg2: memref<1xi32, #tpu.memory_space<smem>>) -> (i32, i32, i32) {
    %c0_i32 = arith.constant 0 : i32
    %c0_i32_0 = arith.constant 0 : i32
    %c0_i32_1 = arith.constant 0 : i32
    %c0_i32_2 = arith.constant 0 : i32
    return %c0_i32, %c0_i32_0, %c0_i32_1 : i32, i32, i32
  }
  func.func @transform_1(%arg0: i32, %arg1: memref<26xf32, #tpu.memory_space<smem>>, %arg2: memref<1xi32, #tpu.memory_space<smem>>) -> (i32, i32) {
    %c0_i32 = arith.constant 0 : i32
    %c0_i32_0 = arith.constant 0 : i32
    %c0_i32_1 = arith.constant 0 : i32
    return %c0_i32, %c0_i32_0 : i32, i32
  }
  func.func @transform_2(%arg0: i32, %arg1: memref<26xf32, #tpu.memory_space<smem>>, %arg2: memref<1xi32, #tpu.memory_space<smem>>) -> (i32, i32) {
    %c0_i32 = arith.constant 0 : i32
    %c0_i32_0 = arith.constant 0 : i32
    %c0_i32_1 = arith.constant 0 : i32
    return %c0_i32, %c0_i32_0 : i32, i32
  }
  func.func @transform_3(%arg0: i32, %arg1: memref<26xf32, #tpu.memory_space<smem>>, %arg2: memref<1xi32, #tpu.memory_space<smem>>) -> (i32, i32) {
    %c0_i32 = arith.constant 0 : i32
    %c0_i32_0 = arith.constant 0 : i32
    %c0_i32_1 = arith.constant 0 : i32
    return %c0_i32, %c0_i32_0 : i32, i32
  }
  func.func @transform_4(%arg0: i32, %arg1: memref<26xf32, #tpu.memory_space<smem>>, %arg2: memref<1xi32, #tpu.memory_space<smem>>) -> (i32, i32) {
    %c0_i32 = arith.constant 0 : i32
    %c0_i32_0 = arith.constant 0 : i32
    %c0_i32_1 = arith.constant 0 : i32
    return %c0_i32, %c0_i32_0 : i32, i32
  }
  func.func @transform_5(%arg0: i32, %arg1: memref<26xf32, #tpu.memory_space<smem>>, %arg2: memref<1xi32, #tpu.memory_space<smem>>) -> (i32, i32) {
    %c0_i32 = arith.constant 0 : i32
    %c0_i32_0 = arith.constant 0 : i32
    %c0_i32_1 = arith.constant 0 : i32
    return %c0_i32, %c0_i32_0 : i32, i32
  }
}

</mosaic_0001>

<bundles_post_ra>
// kernel: _diffusion_forward_jit.1
= control target key start
LH: loop header
LB: loop body
LE: loop exit
PB: predicated region body
PF: predicated region fallthrough
CT: control target
= control target key end

     0   :  { %s281_s27 = smov [#allocation3]   ;;  %s447_s0 = inlined_call_operand.vmem [shape: f32[26], index: 0, kind: input, shape index: {}]   ;;  %s448_s1 = inlined_call_operand.<no memory space> [shape: s32[1], index: 1, kind: input, shape index: {}]   ;;  %s449_s2 = inlined_call_operand.vmem [shape: f32[2,3,256], index: 2, kind: input, shape index: {}]   ;;  %s450_s3 = inlined_call_operand.vmem [shape: f32[2,256], index: 3, kind: input, shape index: {}]   ;;  %s451_s4 = inlined_call_operand.vmem [shape: f32[2,256], index: 4, kind: output, shape index: {0}]   ;;  %s452_s5 = inlined_call_operand.vmem [shape: f32[2,256], index: 5, kind: output, shape index: {1}]   ;;  %s453_s6 = inlined_call_operand.vmem [shape: f32[2,256], index: 6, kind: output, shape index: {2}]   ;;  %s454_s7 = inlined_call_operand.vmem [shape: f32[2,256], index: 7, kind: output, shape index: {3}]  }
   0x1   :  { %s14_s26 = sshll.u32 %s447_s0, 4  ;;  %s15_s26 = int_to_ptr.vmem [resolvable:$true] %s14_s26 }
   0x2   :  { %17 = dma.vmem_to_smem %s15_s26, 16, %s281_s27, [#allocation2] }
   0x3   :  { %279 = dma.done.wait [#allocation2], 16 }
   0x4   :  { %280 = vsyncadd [#allocation2], 4294967280 }
   0x5   :  { %21 = sfence }
   0x6   :  { %s27_s30 = sld [smem:[#allocation3 + %s448_s1]]  ;;  %v331_v0 = vld [vmem:[%s449_s2] sm:$0x77]  ;;  %v336_v1 = vld [vmem:[%s449_s2 + $0x8] sm:$0x77]  ;;  %vm49_vm0 = vcmask 1041408  }
   0x7   :  { %s247_s0 = sld [smem:[#allocation3 + $0x15]]  ;;  %v39_v7 = vld [vmem:[%s450_s3] sm:$0xf]  ;;  %vm57_vm1 = vcmask 1041409   ;;  %vm59_vm2 = vcmask 1043459   ;;  %vm61_vm3 = vcmask 1045509  }
   0x8   :  { %s248_s2 = sld [smem:[#allocation3 + $0x16]]  ;;  %vm63_vm4 = vcmask 1047559   ;;  %s29_s22 = sadd.s32 10, %s448_s1 }
   0x9   :  { %s249_s15 = sld [smem:[#allocation3 + $0x17]]  ;;  %p252_p0 = scmp.lt.s32.totalorder %s448_s1, 1 }
   0xa   :  { %s246_s3 = sld [smem:[#allocation3 + $0x14]]  ;;  %s253_s10 = sadd.s32 (!%p252_p0), 4294967295, %s448_s1 }
   0xb   :  { %s250_s16 = sld [smem:[#allocation3 + $0x18]]  ;;  %s149_s13 = sadd.s32 (!%p252_p0), 9, %s448_s1 }
   0xc   :  { %s28_s8 = ssub.f32 1.0, %s27_s30  ;;  %v40_v8 = vstv %s27_s30 }
   0xd   :  { %v41_v12 = vmul.f32 %v40_v8, %v39_v7  ;;  %v349_v17 = vstv %s247_s0  ;;  %s251_s23 = sld [smem:[#allocation3 + $0x19]] }
   0xe   :  { %v42_v2 = vstv %s28_s8  ;;  %v80_v20 = vstv %s248_s2  ;;  %s30_s24 = sld [smem:[#allocation3 + %s29_s22]] }
   0xf   :  { %v43_v3 = vmul.f32 %v42_v2, %v331_v0  ;;  %v44_v4 = vmul.f32 %v42_v2, %v336_v1  ;;  %v358_v21 = vstv %s249_s15  ;;  %v81_v22 = vmul.f32 %v80_v20, %v331_v0  ;;  %s147_s11 = sld [smem:[#allocation3 + %s253_s10]] (!%p252_p0) }
  0x10   :  { %v67_v23 = vstv %s246_s3  ;;  %v82_v25 = vmul.f32 %v80_v20, %v336_v1  ;;  %v94_v26 = vmul.f32 %v358_v21, %v39_v7  ;;  %s150_s14 = sld [smem:[#allocation3 + %s149_s13]] (!%p252_p0) }
  0x11   :  { %v47_v5 = vrot.slane %v43_v3, 2  ;;  %v48_v6 = vrot.slane %v44_v4, 2  ;;  %v103_v24 = vstv %s250_s16  ;;  %v364_v27 = vmul.f32 %v67_v23, %v331_v0 }
  0x12   :  { %v85_v28 = vrot.slane %v81_v22, 6  ;;  %v104_v29 = vmul.f32 %v103_v24, %v331_v0  ;;  %v371_v31 = vmul.f32 %v67_v23, %v336_v1  ;;  %v87_v33 = vrot.slane %v82_v25, 6 }
  0x13   :  { %v50_v9 = vsel %vm49_vm0, %v43_v3, %v47_v5  ;;  %v51_v10 = vsel %vm49_vm0, %v44_v4, %v48_v6  ;;  %v105_v34 = vmul.f32 %v103_v24, %v336_v1  ;;  %v386_v48 = vstv %s251_s23 }
  0x14   :  { %v52_v11 = vrot.slane %v50_v9, 1  ;;  %v375_v36 = vrot.slane %v85_v28, 4  ;;  %v108_v37 = vrot.slane %v104_v29, 5  ;;  %v378_v39 = vrot.slane %v87_v33, 4 }
  0x15   :  { %v110_v40 = vrot.slane %v105_v34, 5  ;;  %v119_v51 = vstv %s30_s24  ;;  %s148_s12 = ssub.f32 (!%p252_p0), 1.0, %s147_s11 }
  0x16   :  { %v58_v13 = vsel %vm57_vm1, %v51_v10, %v52_v11  ;;  %v381_v42 = vrot.slane %v108_v37, 4 }
  0x17   :  { %v60_v14 = vsel %vm59_vm2, %v51_v10, %v58_v13  ;;  %v384_v47 = vrot.slane %v110_v40, 4 }
  0x18   :  { %v62_v15 = vsel %vm61_vm3, %v51_v10, %v60_v14 }
  0x19   :  { %v64_v16 = vsel %vm63_vm4, %v51_v10, %v62_v15 }
  0x1a   :  { %v66_v18 = vadd.f32 %v64_v16, %v41_v12 }
  0x1c   :  { %v71_v19 = vmul.f32 %v349_v17, %v66_v18  ;;  %139 = vst [vmem:[%s452_s5] sm:$0xf] %v66_v18 }
  0x1d   :  { %141 = vst [vmem:[%s454_s7] sm:$0xf] %v66_v18 }
  0x1e   :  { %73 = vst [vmem:[#allocation1] ss:$2 sm:$0xff] %v71_v19 }
  0x25   :  { %v74_v30 = vld.sshfl [vmem:[#allocation1] sm:$0xff pattern:$0x75643120] }
  0x26   :  { %v75_v32 = vrot.slane %v74_v30, 1  ;;  %96 = vst [vmem:[#allocation1] ss:$2 sm:$0xff] %v94_v26  ;;  %v78_v35 = vadd.f32 %v74_v30, %v364_v27 }
  0x28   :  { %v79_v38 = vadd.f32 %v75_v32, %v371_v31  ;;  %v91_v41 = vadd.f32 %v375_v36, %v78_v35 }
  0x2a   :  { %v92_v44 = vadd.f32 %v378_v39, %v79_v38 }
  0x2d   :  { %v97_v43 = vld.sshfl [vmem:[#allocation1] sm:$0xff pattern:$0x75643120] }
  0x2e   :  { %v98_v45 = vrot.slane %v97_v43, 1  ;;  %v101_v46 = vadd.f32 %v97_v43, %v91_v41 }
  0x30   :  { %v102_v49 = vadd.f32 %v98_v45, %v92_v44  ;;  %v114_v50 = vadd.f32 %v381_v42, %v101_v46 }
  0x32   :  { %v115_v52 = vadd.f32 %v384_v47, %v102_v49  ;;  %v117_v53 = vadd.f32 %v386_v48, %v114_v50 }
  0x34   :  { %v118_v54 = vadd.f32 %v386_v48, %v115_v52  ;;  %v120_v55 = vadd.f32 %v119_v51, %v117_v53 }
  0x36   :  { %v121_v56 = vadd.f32 %v119_v51, %v118_v54  ;;  %259 = vtanh.f32 %v120_v55 }
  0x38   :  { %261 = vtanh.f32 %v121_v56 }
  0x3c   :  { %v260_v57 = vpop.eup %259 }
  0x3d   :  { %v126_v59 = vrot.slane %v260_v57, 2 }
  0x3e   :  { %v262_v58 = vpop.eup %261 }
  0x3f   :  { %v127_v60 = vrot.slane %v262_v58, 2  ;;  %v128_v63 = vsel %vm49_vm0, %v260_v57, %v126_v59 }
  0x41   :  { %v129_v61 = vsel %vm49_vm0, %v262_v58, %v127_v60 }
  0x42   :  { %v132_v62 = vrot.slane %v129_v61, 7 }
  0x44   :  { %v133_v2 = vsel %vm57_vm1, %v132_v62, %v128_v63 }
  0x45   :  { %v134_v3 = vsel %vm59_vm2, %v132_v62, %v133_v2  ;;  %145 = sbr.rel (%p252_p0) target bundleno = 115 (0x73), region = 13 }
  0x46   :  { %v135_v4 = vsel %vm61_vm3, %v132_v62, %v134_v3 }
  0x47   :  { %v136_v5 = vsel %vm63_vm4, %v132_v62, %v135_v4 }
  0x48   :  { %138 = vst [vmem:[%s451_s4] sm:$0xf] %v136_v5 }
  0x49   :  { %140 = vst [vmem:[%s453_s6] sm:$0xf] %v136_v5 }
  0x4a   :  { %v151_v6 = vstv %s147_s11  ;;  %v154_v7 = vstv %s148_s12  ;;  %v173_v22 = vmul.f32 %v260_v57, %v358_v21  ;;  %v174_v23 = vmul.f32 %v262_v58, %v358_v21 }
  0x4b   :  { %v152_v8 = vmul.f32 %v260_v57, %v151_v6  ;;  %v153_v9 = vmul.f32 %v262_v58, %v151_v6  ;;  %v155_v10 = vmul.f32 %v154_v7, %v331_v0  ;;  %v156_v11 = vmul.f32 %v154_v7, %v336_v1 }
  0x4c   :  { %v256_v24 = vrot.slane %v331_v0, 9  ;;  %v257_v25 = vrot.slane %v336_v1, 9  ;;  %v181_v41 = vstv %s150_s14 }
  0x4d   :  { %v254_v12 = vrot.slane %v155_v10, 9  ;;  %v255_v13 = vrot.slane %v156_v11, 9 }
  0x4e   :  { %v192_v34 = vsub.f32 %v260_v57, %v256_v24  ;;  %v193_v37 = vsub.f32 %v262_v58, %v257_v25 }
  0x4f   :  { %v165_v14 = vadd.f32 %v254_v12, %v152_v8  ;;  %v166_v15 = vadd.f32 %v255_v13, %v153_v9 }
  0x50   :  { %v194_v43 = vmul.f32 0.1, %v192_v34  ;;  %v195_v44 = vmul.f32 0.1, %v193_v37 }
  0x51   :  { %v167_v16 = vmul.f32 %v165_v14, %v349_v17  ;;  %v168_v18 = vmul.f32 %v166_v15, %v349_v17  ;;  %v217_v19 = vrot.slane %v165_v14, 2  ;;  %v218_v20 = vrot.slane %v166_v15, 2 }
  0x53   :  { %v169_v26 = vadd.f32 %v167_v16, %v364_v27  ;;  %v170_v28 = vadd.f32 %v168_v18, %v371_v31  ;;  %v219_v29 = vsel %vm49_vm0, %v165_v14, %v217_v19  ;;  %v220_v30 = vsel %vm49_vm0, %v166_v15, %v218_v20 }
  0x54   :  { %v223_v17 = vrot.slane %v220_v30, 7 }
  0x55   :  { %v171_v32 = vadd.f32 %v169_v26, %v375_v36  ;;  %v172_v33 = vadd.f32 %v170_v28, %v378_v39 }
  0x56   :  { %v224_v21 = vsel %vm57_vm1, %v223_v17, %v219_v29 }
  0x57   :  { %v175_v35 = vadd.f32 %v173_v22, %v171_v32  ;;  %v176_v0 = vadd.f32 %v174_v23, %v172_v33  ;;  %v225_v1 = vsel %vm59_vm2, %v223_v17, %v224_v21 }
  0x58   :  { %v226_v27 = vsel %vm61_vm3, %v223_v17, %v225_v1 }
  0x59   :  { %v177_v31 = vadd.f32 %v175_v35, %v381_v42  ;;  %v178_v38 = vadd.f32 %v176_v0, %v384_v47  ;;  %v227_v40 = vsel %vm63_vm4, %v223_v17, %v226_v27 }
  0x5a   :  { %229 = vst [vmem:[%s454_s7] sm:$0xf] %v227_v40 }
  0x5b   :  { %v179_v36 = vadd.f32 %v177_v31, %v386_v48  ;;  %v180_v39 = vadd.f32 %v178_v38, %v386_v48 }
  0x5d   :  { %v182_v45 = vadd.f32 %v181_v41, %v179_v36  ;;  %v183_v46 = vadd.f32 %v181_v41, %v180_v39 }
  0x5f   :  { %v196_v49 = vadd.f32 %v194_v43, %v182_v45  ;;  %v197_v50 = vadd.f32 %v195_v44, %v183_v46 }
  0x61   :  { %263 = vtanh.f32 %v196_v49 }
  0x62   :  { %265 = vtanh.f32 %v197_v50 }
  0x67   :  { %v264_v42 = vpop.eup %263 }
  0x68   :  { %v266_v47 = vpop.eup %265  ;;  %v202_v51 = vrot.slane %v264_v42, 2 }
  0x69   :  { %v203_v52 = vrot.slane %v266_v47, 2 }
  0x6a   :  { %v204_v53 = vsel %vm49_vm0, %v264_v42, %v202_v51 }
  0x6b   :  { %v205_v54 = vsel %vm49_vm0, %v266_v47, %v203_v52 }
  0x6c   :  { %v208_v55 = vrot.slane %v205_v54, 7 }
  0x6e   :  { %v209_v56 = vsel %vm57_vm1, %v208_v55, %v204_v53 }
  0x6f   :  { %v210_v48 = vsel %vm59_vm2, %v208_v55, %v209_v56 }
  0x70   :  { %v211_v57 = vsel %vm61_vm3, %v208_v55, %v210_v48 }
  0x71   :  { %v212_v58 = vsel %vm63_vm4, %v208_v55, %v211_v57 }
  0x72   :  { %214 = vst [vmem:[%s453_s6] sm:$0xf] %v212_v58 }
  0x73 PF:  {}

</bundles_post_ra>
